<compile_context>
chip_gen: v7x
topology: tpu7x:2x2x1
jax: 0.10.0
libtpu: 0.0.40
codegen_flags: <defaults>
</compile_context>

<pallas_src>
import jax
import jax.numpy as jnp
from jax.experimental import pallas as pl
from jax.experimental.pallas import tpu as pltpu

IN_FEATURES = 3
OUT_FEATURES = 5


def _round_up(x: int, m: int) -> int:
    return ((x + m - 1) // m) * m


def _mlp_kernel(w_ref, b_ref, x_ref, o_ref):
    """w_ref: SMEM (OUT, IN); b_ref: SMEM (OUT,);
    x_ref: VMEM (IN, TN); o_ref: VMEM (OUT, TN)."""
    # Load the 3 lane-dense input rows once per tile.
    rows = [x_ref[k:k + 1, :] for k in range(IN_FEATURES)]  # each (1, TN)
    # Fully unrolled 5x3 = 15 scalar * vector FMAs on the VPU.
    for o in range(OUT_FEATURES):
        acc = rows[0] * w_ref[o, 0] + b_ref[o]
        for k in range(1, IN_FEATURES):
            acc = acc + rows[k] * w_ref[o, k]
        o_ref[o:o + 1, :] = jnp.tanh(acc)  # EUP transcendental, lane-dense store


def mlp1layer_forward(x, w, b, *, tile_n=2048):
    """x: (N, IN_FEATURES) f32; w: (OUT_FEATURES, IN_FEATURES) (PyTorch layout);
    b: (OUT_FEATURES,). Returns (N, OUT_FEATURES) f32."""
    n = x.shape[0]

    # Lane-dense layout: batch on lanes. Tile must be a multiple of 128.
    tile = min(tile_n, _round_up(max(n, 1), 128))
    n_pad = _round_up(max(n, 1), tile)
    xt = jnp.zeros((IN_FEATURES, n_pad), jnp.float32).at[:, :n].set(x.T)

    grid = (n_pad // tile,)

    y_t = pl.pallas_call(
        _mlp_kernel,
        out_shape=jax.ShapeDtypeStruct((OUT_FEATURES, n_pad), jnp.float32),
        grid=grid,
        in_specs=[
            # 15 weights + 5 biases: keep as scalars in SMEM (no VMEM block,
            # no masked vector loads for 20 numbers).
            pl.BlockSpec(memory_space=pltpu.MemorySpace.SMEM),  # w (OUT, IN)
            pl.BlockSpec(memory_space=pltpu.MemorySpace.SMEM),  # b (OUT,)
            # x tile: second-to-last dim equals full array dim (3), last dim
            # is a multiple of 128 -> (8,128) constraint satisfied.
            pl.BlockSpec((IN_FEATURES, tile), lambda i: (0, i)),
        ],
        out_specs=pl.BlockSpec((OUT_FEATURES, tile), lambda i: (0, i)),
        compiler_params=pltpu.CompilerParams(
            dimension_semantics=("parallel",),  # megacore sharding on v7x
        ),
        cost_estimate=pl.CostEstimate(
            flops=2 * IN_FEATURES * OUT_FEATURES * n_pad,
            transcendentals=OUT_FEATURES * n_pad,
            bytes_accessed=(IN_FEATURES + OUT_FEATURES) * n_pad * 4,
        ),
    )(w, b, xt)

    # Back to PyTorch's (N, OUT) row-major convention; drop padded rows.
    return y_t[:, :n].T


def init_params(key):
    """Deterministic parameter init matching nn.Linear(3, 5) shapes.

    PyTorch default init is U(-1/sqrt(fan_in), 1/sqrt(fan_in)); reproduced
    deterministically with the JAX PRNG (not the torch seed).
    Weight stored in PyTorch layout (OUT_FEATURES, IN_FEATURES).
    """
    kw, kb = jax.random.split(key)
    bound = 1.0 / jnp.sqrt(jnp.float32(IN_FEATURES))
    w = jax.random.uniform(
        kw, (OUT_FEATURES, IN_FEATURES), jnp.float32, -bound, bound
    )
    b = jax.random.uniform(kb, (OUT_FEATURES,), jnp.float32, -bound, bound)
    return w, b


if __name__ == "__main__":
    key = jax.random.PRNGKey(0)
    k_x, k_p = jax.random.split(key)

    N = 8  # small 2-D float input, consistent with the (-1, -1) annotation
    x = jax.random.normal(k_x, (N, IN_FEATURES), jnp.float32)
    w, b = init_params(k_p)

    out = mlp1layer_forward(x, w, b)
    out = jax.block_until_ready(out)

    # Reference check in plain JAX (PyTorch semantics: y = tanh(x @ W^T + b))
    ref = jnp.tanh(x @ w.T + b[None, :])
    assert out.shape == (N, OUT_FEATURES)
    assert jnp.allclose(out, ref, atol=1e-5, rtol=1e-5)

    print("KERNEL_OK")
</pallas_src>

<mosaic_0001>
module attributes {stable_mosaic.version = 11 : i64} {
  func.func @_mlp_kernel(%arg0: i32, %arg1: memref<5x3xf32, #tpu.memory_space<smem>>, %arg2: memref<5xf32, #tpu.memory_space<smem>>, %arg3: memref<3x128xf32, #tpu.memory_space<vmem>>, %arg4: memref<5x128xf32, #tpu.memory_space<vmem>>) attributes {dimension_semantics = [#tpu.dimension_semantics<parallel>], iteration_bounds = array<i64: 1>, scalar_prefetch = 0 : i64, scratch_operands = 0 : i64, tpu.core_type = #tpu.core_type<tc>, window_params = [{transform_indices = @transform_0, window_bounds = array<i64: 5, 3>}, {transform_indices = @transform_1, window_bounds = array<i64: 5>}, {transform_indices = @transform_2, window_bounds = array<i64: 3, 128>}, {transform_indices = @transform_3, window_bounds = array<i64: 5, 128>}]} {
    %c0 = arith.constant 0 : index
    %c0_0 = arith.constant 0 : index
    %0 = vector.load %arg3[%c0, %c0_0] : memref<3x128xf32, #tpu.memory_space<vmem>>, vector<1x128xf32>
    %c1 = arith.constant 1 : index
    %c0_1 = arith.constant 0 : index
    %1 = vector.load %arg3[%c1, %c0_1] : memref<3x128xf32, #tpu.memory_space<vmem>>, vector<1x128xf32>
    %c2 = arith.constant 2 : index
    %c0_2 = arith.constant 0 : index
    %2 = vector.load %arg3[%c2, %c0_2] : memref<3x128xf32, #tpu.memory_space<vmem>>, vector<1x128xf32>
    %c0_3 = arith.constant 0 : index
    %c0_4 = arith.constant 0 : index
    %3 = memref.load %arg1[%c0_3, %c0_4] : memref<5x3xf32, #tpu.memory_space<smem>>
    %4 = vector.broadcast %3 : f32 to vector<1x128xf32>
    %5 = arith.mulf %0, %4 : vector<1x128xf32>
    %c0_5 = arith.constant 0 : index
    %6 = memref.load %arg2[%c0_5] : memref<5xf32, #tpu.memory_space<smem>>
    %7 = vector.broadcast %6 : f32 to vector<1x128xf32>
    %8 = arith.addf %5, %7 : vector<1x128xf32>
    %c0_6 = arith.constant 0 : index
    %c1_7 = arith.constant 1 : index
    %9 = memref.load %arg1[%c0_6, %c1_7] : memref<5x3xf32, #tpu.memory_space<smem>>
    %10 = vector.broadcast %9 : f32 to vector<1x128xf32>
    %11 = arith.mulf %1, %10 : vector<1x128xf32>
    %12 = arith.addf %8, %11 : vector<1x128xf32>
    %c0_8 = arith.constant 0 : index
    %c2_9 = arith.constant 2 : index
    %13 = memref.load %arg1[%c0_8, %c2_9] : memref<5x3xf32, #tpu.memory_space<smem>>
    %14 = vector.broadcast %13 : f32 to vector<1x128xf32>
    %15 = arith.mulf %2, %14 : vector<1x128xf32>
    %16 = arith.addf %12, %15 : vector<1x128xf32>
    %17 = math.tanh %16 : vector<1x128xf32>
    %c0_10 = arith.constant 0 : index
    %c0_11 = arith.constant 0 : index
    %18 = vector.load %arg4[%c0_10, %c0_11] : memref<5x128xf32, #tpu.memory_space<vmem>>, vector<1x128xf32>
    tpu.vector_store %arg4[%c0_10, %c0_11], %17 {strides = array<i32>} : memref<5x128xf32, #tpu.memory_space<vmem>>, vector<1x128xf32>,
    %c1_12 = arith.constant 1 : index
    %c0_13 = arith.constant 0 : index
    %19 = memref.load %arg1[%c1_12, %c0_13] : memref<5x3xf32, #tpu.memory_space<smem>>
    %20 = vector.broadcast %19 : f32 to vector<1x128xf32>
    %21 = arith.mulf %0, %20 : vector<1x128xf32>
    %c1_14 = arith.constant 1 : index
    %22 = memref.load %arg2[%c1_14] : memref<5xf32, #tpu.memory_space<smem>>
    %23 = vector.broadcast %22 : f32 to vector<1x128xf32>
    %24 = arith.addf %21, %23 : vector<1x128xf32>
    %c1_15 = arith.constant 1 : index
    %c1_16 = arith.constant 1 : index
    %25 = memref.load %arg1[%c1_15, %c1_16] : memref<5x3xf32, #tpu.memory_space<smem>>
    %26 = vector.broadcast %25 : f32 to vector<1x128xf32>
    %27 = arith.mulf %1, %26 : vector<1x128xf32>
    %28 = arith.addf %24, %27 : vector<1x128xf32>
    %c1_17 = arith.constant 1 : index
    %c2_18 = arith.constant 2 : index
    %29 = memref.load %arg1[%c1_17, %c2_18] : memref<5x3xf32, #tpu.memory_space<smem>>
    %30 = vector.broadcast %29 : f32 to vector<1x128xf32>
    %31 = arith.mulf %2, %30 : vector<1x128xf32>
    %32 = arith.addf %28, %31 : vector<1x128xf32>
    %33 = math.tanh %32 : vector<1x128xf32>
    %c1_19 = arith.constant 1 : index
    %c0_20 = arith.constant 0 : index
    %34 = vector.load %arg4[%c1_19, %c0_20] : memref<5x128xf32, #tpu.memory_space<vmem>>, vector<1x128xf32>
    tpu.vector_store %arg4[%c1_19, %c0_20], %33 {strides = array<i32>} : memref<5x128xf32, #tpu.memory_space<vmem>>, vector<1x128xf32>,
    %c2_21 = arith.constant 2 : index
    %c0_22 = arith.constant 0 : index
    %35 = memref.load %arg1[%c2_21, %c0_22] : memref<5x3xf32, #tpu.memory_space<smem>>
    %36 = vector.broadcast %35 : f32 to vector<1x128xf32>
    %37 = arith.mulf %0, %36 : vector<1x128xf32>
    %c2_23 = arith.constant 2 : index
    %38 = memref.load %arg2[%c2_23] : memref<5xf32, #tpu.memory_space<smem>>
    %39 = vector.broadcast %38 : f32 to vector<1x128xf32>
    %40 = arith.addf %37, %39 : vector<1x128xf32>
    %c2_24 = arith.constant 2 : index
    %c1_25 = arith.constant 1 : index
    %41 = memref.load %arg1[%c2_24, %c1_25] : memref<5x3xf32, #tpu.memory_space<smem>>
    %42 = vector.broadcast %41 : f32 to vector<1x128xf32>
    %43 = arith.mulf %1, %42 : vector<1x128xf32>
    %44 = arith.addf %40, %43 : vector<1x128xf32>
    %c2_26 = arith.constant 2 : index
    %c2_27 = arith.constant 2 : index
    %45 = memref.load %arg1[%c2_26, %c2_27] : memref<5x3xf32, #tpu.memory_space<smem>>
    %46 = vector.broadcast %45 : f32 to vector<1x128xf32>
    %47 = arith.mulf %2, %46 : vector<1x128xf32>
    %48 = arith.addf %44, %47 : vector<1x128xf32>
    %49 = math.tanh %48 : vector<1x128xf32>
    %c2_28 = arith.constant 2 : index
    %c0_29 = arith.constant 0 : index
    %50 = vector.load %arg4[%c2_28, %c0_29] : memref<5x128xf32, #tpu.memory_space<vmem>>, vector<1x128xf32>
    tpu.vector_store %arg4[%c2_28, %c0_29], %49 {strides = array<i32>} : memref<5x128xf32, #tpu.memory_space<vmem>>, vector<1x128xf32>,
    %c3 = arith.constant 3 : index
    %c0_30 = arith.constant 0 : index
    %51 = memref.load %arg1[%c3, %c0_30] : memref<5x3xf32, #tpu.memory_space<smem>>
    %52 = vector.broadcast %51 : f32 to vector<1x128xf32>
    %53 = arith.mulf %0, %52 : vector<1x128xf32>
    %c3_31 = arith.constant 3 : index
    %54 = memref.load %arg2[%c3_31] : memref<5xf32, #tpu.memory_space<smem>>
    %55 = vector.broadcast %54 : f32 to vector<1x128xf32>
    %56 = arith.addf %53, %55 : vector<1x128xf32>
    %c3_32 = arith.constant 3 : index
    %c1_33 = arith.constant 1 : index
    %57 = memref.load %arg1[%c3_32, %c1_33] : memref<5x3xf32, #tpu.memory_space<smem>>
    %58 = vector.broadcast %57 : f32 to vector<1x128xf32>
    %59 = arith.mulf %1, %58 : vector<1x128xf32>
    %60 = arith.addf %56, %59 : vector<1x128xf32>
    %c3_34 = arith.constant 3 : index
    %c2_35 = arith.constant 2 : index
    %61 = memref.load %arg1[%c3_34, %c2_35] : memref<5x3xf32, #tpu.memory_space<smem>>
    %62 = vector.broadcast %61 : f32 to vector<1x128xf32>
    %63 = arith.mulf %2, %62 : vector<1x128xf32>
    %64 = arith.addf %60, %63 : vector<1x128xf32>
    %65 = math.tanh %64 : vector<1x128xf32>
    %c3_36 = arith.constant 3 : index
    %c0_37 = arith.constant 0 : index
    %66 = vector.load %arg4[%c3_36, %c0_37] : memref<5x128xf32, #tpu.memory_space<vmem>>, vector<1x128xf32>
    tpu.vector_store %arg4[%c3_36, %c0_37], %65 {strides = array<i32>} : memref<5x128xf32, #tpu.memory_space<vmem>>, vector<1x128xf32>,
    %c4 = arith.constant 4 : index
    %c0_38 = arith.constant 0 : index
    %67 = memref.load %arg1[%c4, %c0_38] : memref<5x3xf32, #tpu.memory_space<smem>>
    %68 = vector.broadcast %67 : f32 to vector<1x128xf32>
    %69 = arith.mulf %0, %68 : vector<1x128xf32>
    %c4_39 = arith.constant 4 : index
    %70 = memref.load %arg2[%c4_39] : memref<5xf32, #tpu.memory_space<smem>>
    %71 = vector.broadcast %70 : f32 to vector<1x128xf32>
    %72 = arith.addf %69, %71 : vector<1x128xf32>
    %c4_40 = arith.constant 4 : index
    %c1_41 = arith.constant 1 : index
    %73 = memref.load %arg1[%c4_40, %c1_41] : memref<5x3xf32, #tpu.memory_space<smem>>
    %74 = vector.broadcast %73 : f32 to vector<1x128xf32>
    %75 = arith.mulf %1, %74 : vector<1x128xf32>
    %76 = arith.addf %72, %75 : vector<1x128xf32>
    %c4_42 = arith.constant 4 : index
    %c2_43 = arith.constant 2 : index
    %77 = memref.load %arg1[%c4_42, %c2_43] : memref<5x3xf32, #tpu.memory_space<smem>>
    %78 = vector.broadcast %77 : f32 to vector<1x128xf32>
    %79 = arith.mulf %2, %78 : vector<1x128xf32>
    %80 = arith.addf %76, %79 : vector<1x128xf32>
    %81 = math.tanh %80 : vector<1x128xf32>
    %c4_44 = arith.constant 4 : index
    %c0_45 = arith.constant 0 : index
    %82 = vector.load %arg4[%c4_44, %c0_45] : memref<5x128xf32, #tpu.memory_space<vmem>>, vector<1x128xf32>
    tpu.vector_store %arg4[%c4_44, %c0_45], %81 {strides = array<i32>} : memref<5x128xf32, #tpu.memory_space<vmem>>, vector<1x128xf32>,
    return
  }
  func.func @transform_0(%arg0: i32) -> (i32, i32) {
    %c0_i32 = arith.constant 0 : i32
    %c0_i32_0 = arith.constant 0 : i32
    %c0_i32_1 = arith.constant 0 : i32
    return %c0_i32, %c0_i32_0 : i32, i32
  }
  func.func @transform_1(%arg0: i32) -> i32 {
    %c0_i32 = arith.constant 0 : i32
    %c0_i32_0 = arith.constant 0 : i32
    return %c0_i32 : i32
  }
  func.func @transform_2(%arg0: i32) -> (i32, i32) {
    %c0_i32 = arith.constant 0 : i32
    %c0_i32_0 = arith.constant 0 : i32
    return %c0_i32, %arg0 : i32, i32
  }
  func.func @transform_3(%arg0: i32) -> (i32, i32) {
    %c0_i32 = arith.constant 0 : i32
    %c0_i32_0 = arith.constant 0 : i32
    return %c0_i32, %arg0 : i32, i32
  }
}

</mosaic_0001>

<bundles_post_ra>
// kernel: tpu_custom_call.1
= control target key start
LH: loop header
LB: loop body
LE: loop exit
PB: predicated region body
PF: predicated region fallthrough
CT: control target
= control target key end

     0   :  { %8 = vsyncpa [#allocation4], 0  ;;  %s311_s0 = inlined_call_operand.vmem [shape: f32[5,3], index: 0, kind: input, shape index: {}]   ;;  %s312_s1 = inlined_call_operand.vmem [shape: f32[5], index: 1, kind: input, shape index: {}]   ;;  %s313_s2 = inlined_call_operand.vmem [shape: f32[3,128], index: 2, kind: input, shape index: {}]   ;;  %s314_s3 = inlined_call_operand.hbm [shape: f32[5,128], index: 3, kind: output, shape index: {}]  }
   0x1   :  { %9 = vsyncpa [#allocation6], 0 }
   0x2   :  { %10 = vsyncpa [#allocation3], 0  ;;  %s17_s14 = sshll.u32 %s311_s0, 4  ;;  %s27_s17 = sshll.u32 %s312_s1, 4  ;;  %s18_s14 = int_to_ptr.vmem [resolvable:$true] %s17_s14  ;;  %s28_s17 = int_to_ptr.vmem [resolvable:$true] %s27_s17 }
   0x3   :  { %s170_s18 = scalar_lea.vmem %s18_s14, 128  ;;  %p175_p1 = scmp.lt.s32.totalorder %s18_s14, %s18_s14 }
   0x4   :  { %p171_p0 = scmp.ne.s32.totalorder %s18_s14, %s170_s18  ;;  %p176_p2 = scmp.lt.s32.totalorder %s170_s18, %s170_s18 }
   0x6   :  { %p177_p3 = por %p176_p2, %p175_p1 }
   0x8   :  { %p178_p4 = pnand %p177_p3, %p171_p0 }
   0xa   :  { %181 = shalt.err (!%p178_p4)
}
   0xb   :  { %s222_s19 = smov [#allocation2]   ;;  %s182_s20 = scalar_lea.vmem %s28_s17, 16 }
   0xc   :  { %20 = dma.vmem_to_smem %s18_s14, 128, %s222_s19, [#allocation4]  }
   0xd   :  { %p183_p5 = scmp.ne.s32.totalorder %s28_s17, %s182_s20  ;;  %p187_p6 = scmp.lt.s32.totalorder %s28_s17, %s28_s17 }
   0xe   :  { %p188_p7 = scmp.lt.s32.totalorder %s182_s20, %s182_s20 }
  0x10   :  { %p189_p8 = por %p188_p7, %p187_p6 }
  0x12   :  { %p190_p9 = pnand %p189_p8, %p183_p5 }
  0x14   :  { %193 = shalt.err (!%p190_p9)
}
  0x15   :  { %s223_s0 = smov [#allocation5]  }
  0x16   :  { %30 = dma.vmem_to_smem %s28_s17, 16, %s223_s0, [#allocation6]  }
  0x17   :  { %216 = dma.done.wait [#allocation4], 128  }
  0x18   :  { %217 = vsyncadd [#allocation4], 4294967168 }
  0x19   :  { %218 = dma.done.wait [#allocation6], 16  }
  0x1a   :  { %219 = vsyncadd [#allocation6], 4294967280 }
  0x1b   :  { %39 = sfence }
  0x1c   :  { %s43_s1 = sld [smem:[#allocation2]]  ;;  %s139_s22 = sld [smem:[#allocation2 + $0x1]]  ;;  %v40_v0 = vld [vmem:[%s313_s2] sm:$0x1]  ;;  %v41_v1 = vld [vmem:[%s313_s2 + $0x1] sm:$0x1] }
  0x1d   :  { %s46_s21 = sld [smem:[#allocation5]]  ;;  %s140_s23 = sld [smem:[#allocation2 + $0x2]]  ;;  %v42_v2 = vld [vmem:[%s313_s2 + $0x2] sm:$0x1] }
  0x1e   :  { %s141_s24 = sld [smem:[#allocation2 + $0x80]]  ;;  %s251_s25 = sld [smem:[#allocation5 + $0x1]] }
  0x1f   :  { %s143_s28 = sld [smem:[#allocation2 + $0x81]]  ;;  %s144_s29 = sld [smem:[#allocation2 + $0x82]] }
  0x20   :  { %s259_s5 = sld [smem:[#allocation2 + $0x100]]  ;;  %s261_s6 = sld [smem:[#allocation5 + $0x2]] }
  0x21   :  { %s266_s9 = sld [smem:[#allocation2 + $0x101]]  ;;  %s268_s10 = sld [smem:[#allocation2 + $0x102]] }
  0x22   :  { %v44_v3 = vstv %s43_s1  ;;  %s270_s11 = sld [smem:[#allocation2 + $0x180]]  ;;  %s272_s12 = sld [smem:[#allocation5 + $0x3]]  ;;  %v50_v6 = vstv %s139_s22 }
  0x23   :  { %v47_v4 = vstv %s46_s21  ;;  %v45_v5 = vmul.f32 %v44_v3, %v40_v0  ;;  %v54_v7 = vstv %s140_s23  ;;  %s274_s13 = sld [smem:[#allocation2 + $0x181]]  ;;  %s276_s14 = sld [smem:[#allocation2 + $0x182]]  ;;  %v51_v8 = vmul.f32 %v50_v6, %v41_v1 }
  0x24   :  { %v55_v9 = vmul.f32 %v54_v7, %v42_v2  ;;  %v60_v10 = vstv %s141_s24  ;;  %v63_v11 = vstv %s251_s25  ;;  %s279_s2 = sld [smem:[#allocation2 + $0x200]]  ;;  %s281_s15 = sld [smem:[#allocation5 + $0x4]] }
  0x25   :  { %v48_v12 = vadd.f32 %v47_v4, %v45_v5  ;;  %v61_v13 = vmul.f32 %v60_v10, %v40_v0  ;;  %v66_v14 = vstv %s143_s28  ;;  %v70_v15 = vstv %s144_s29  ;;  %s283_s16 = sld [smem:[#allocation2 + $0x201]]  ;;  %s285_s17 = sld [smem:[#allocation2 + $0x202]] }
  0x26   :  { %v67_v16 = vmul.f32 %v66_v14, %v41_v1  ;;  %v71_v17 = vmul.f32 %v70_v15, %v42_v2  ;;  %v76_v18 = vstv %s259_s5  ;;  %v79_v19 = vstv %s261_s6  ;;  %s224_s18 = smov [#allocation7]  }
  0x27   :  { %v52_v20 = vadd.f32 %v51_v8, %v48_v12  ;;  %v64_v21 = vadd.f32 %v63_v11, %v61_v13  ;;  %v77_v22 = vmul.f32 %v76_v18, %v40_v0  ;;  %v82_v23 = vstv %s266_s9  ;;  %s129_s19 = sshll.u32 %s224_s18, 4  ;;  %s130_s19 = int_to_ptr.vmem [resolvable:$true] %s129_s19 }
  0x28   :  { %v83_v24 = vmul.f32 %v82_v23, %v41_v1  ;;  %v86_v25 = vstv %s268_s10  ;;  %v92_v26 = vstv %s270_s11  ;;  %v95_v27 = vstv %s272_s12  ;;  %s194_s20 = scalar_lea.vmem %s130_s19, 128  ;;  %p199_p11 = scmp.lt.s32.totalorder %s130_s19, %s130_s19 }
  0x29   :  { %v56_v28 = vadd.f32 %v55_v9, %v52_v20  ;;  %v68_v29 = vadd.f32 %v67_v16, %v64_v21  ;;  %v80_v30 = vadd.f32 %v79_v19, %v77_v22  ;;  %v87_v31 = vmul.f32 %v86_v25, %v42_v2  ;;  %p195_p10 = scmp.ne.s32.totalorder %s130_s19, %s194_s20  ;;  %p200_p12 = scmp.lt.s32.totalorder %s194_s20, %s194_s20 }
  0x2a   :  { %v93_v32 = vmul.f32 %v92_v26, %v40_v0  ;;  %v98_v33 = vstv %s274_s13  ;;  %v102_v34 = vstv %s276_s14  ;;  %v108_v35 = vstv %s279_s2 }
  0x2b   :  { %160 = vtanh.f32 %v56_v28  ;;  %v72_v36 = vadd.f32 %v71_v17, %v68_v29  ;;  %v84_v37 = vadd.f32 %v83_v24, %v80_v30  ;;  %v99_v38 = vmul.f32 %v98_v33, %v41_v1  ;;  %p201_p13 = por %p200_p12, %p199_p11 }
  0x2c   :  { %v96_v39 = vadd.f32 %v95_v27, %v93_v32  ;;  %v103_v40 = vmul.f32 %v102_v34, %v42_v2  ;;  %v109_v41 = vmul.f32 %v108_v35, %v40_v0  ;;  %v111_v42 = vstv %s281_s15 }
  0x2d   :  { %162 = vtanh.f32 %v72_v36  ;;  %v88_v43 = vadd.f32 %v87_v31, %v84_v37  ;;  %v114_v44 = vstv %s283_s16  ;;  %v118_v45 = vstv %s285_s17  ;;  %p202_p0 = pnand %p201_p13, %p195_p10 }
  0x2e   :  { %v100_v46 = vadd.f32 %v99_v38, %v96_v39  ;;  %v112_v47 = vadd.f32 %v111_v42, %v109_v41  ;;  %v115_v48 = vmul.f32 %v114_v44, %v41_v1  ;;  %v119_v49 = vmul.f32 %v118_v45, %v42_v2 }
  0x2f   :  { %164 = vtanh.f32 %v88_v43 }
  0x30   :  { %v104_v50 = vadd.f32 %v103_v40, %v100_v46  ;;  %v116_v51 = vadd.f32 %v115_v48, %v112_v47 }
  0x32   :  { %166 = vtanh.f32 %v104_v50  ;;  %v120_v52 = vadd.f32 %v119_v49, %v116_v51 }
  0x34   :  { %168 = vtanh.f32 %v120_v52 }
  0x35   :  { %v161_v53 = vpop.eup %160 }
  0x36   :  { %58 = vst [vmem:[#allocation7] sm:$0x1] %v161_v53 }
  0x37   :  { %v163_v54 = vpop.eup %162 }
  0x38   :  { %74 = vst [vmem:[#allocation7 + $0x1] sm:$0x1] %v163_v54 }
  0x39   :  { %v165_v55 = vpop.eup %164 }
  0x3a   :  { %90 = vst [vmem:[#allocation7 + $0x2] sm:$0x1] %v165_v55 }
  0x3c   :  { %v167_v56 = vpop.eup %166 }
  0x3d   :  { %106 = vst [vmem:[#allocation7 + $0x3] sm:$0x1] %v167_v56 }
  0x3e   :  { %v169_v57 = vpop.eup %168 }
  0x3f   :  { %122 = vst [vmem:[#allocation7 + $0x4] sm:$0x1] %v169_v57 }
  0x40   :  { %205 = shalt.err (!%p202_p0)
}
  0x41   :  { %s206_s21 = scalar_lea.hbm %s314_s3, 128 }
  0x42   :  { %p207_p1 = scmp.ne.s32.totalorder %s314_s3, %s206_s21  ;;  %p210_p2 = scmp.lt.u32.totalorder %s206_s21, %s314_s3 }
  0x44   :  { %p212_p3 = pnand %p210_p2, %p207_p1 }
  0x46   :  { %215 = shalt.err (!%p212_p3)
}
  0x47   :  { %132 = dma.vmem_to_hbm [thread:$0]  %s130_s19, 128, %s314_s3, [#allocation3]  }
  0x48   :  { %220 = dma.done.wait [#allocation3], 128  }
  0x49   :  { %221 = vsyncadd [#allocation3], 4294967168 }
  0x4a   :  { %136 = vsyncpa [#allocation3], 1 }
  0x4b   :  { %137 = vsyncpa [#allocation4], 1 }
  0x4c   :  { %138 = vsyncpa [#allocation6], 1 }

</bundles_post_ra>
